<compile_context>
chip_gen: v7x
topology: tpu7x:2x2x1
jax: 0.10.0
libtpu: 0.0.40
codegen_flags: <defaults>
</compile_context>

<pallas_src>
import functools

import jax
import jax.numpy as jnp
from jax import lax
from jax.experimental import pallas as pl
from jax.experimental.pallas import tpu as pltpu

# Make the XLA reference matmuls full-precision f32 so it can be compared against
# the in-kernel MXU matmuls at tight tolerance.
jax.config.update("jax_default_matmul_precision", "highest")


# ----------------------------------------------------------------------------
# helpers
# ----------------------------------------------------------------------------
def _pick_row_tile(n, max_tile=512):
    r8 = ((n + 7) // 8) * 8
    return min(r8, max_tile)


def _pad_rows(a, n_to):
    n = a.shape[0]
    if n_to == n:
        return a
    return jnp.pad(a, ((0, n_to - n),) + ((0, 0),) * (a.ndim - 1))


# ----------------------------------------------------------------------------
# kernel 1: fused input projections for both LSTM directions
# ----------------------------------------------------------------------------
def _input_proj_kernel(x_ref, w_ref, b_ref, of_ref, ob_ref, *, G):
    # x_ref: (RT, D), w_ref: (D, 2G), b_ref: (1, 2G); G = 4H
    res = jnp.dot(x_ref[...], w_ref[...],
                  preferred_element_type=jnp.float32) + b_ref[...]
    of_ref[...] = res[:, :G].astype(of_ref.dtype)
    ob_ref[...] = res[:, G:].astype(ob_ref.dtype)


def _input_projection(x_flat, w_cat, b_cat, G):
    Np, D = x_flat.shape
    RT = _pick_row_tile(Np)
    Nr = pl.cdiv(Np, RT) * RT
    x_p = _pad_rows(x_flat, Nr)
    kernel = functools.partial(_input_proj_kernel, G=G)
    pf, pb = pl.pallas_call(
        kernel,
        out_shape=(jax.ShapeDtypeStruct((Nr, G), jnp.float32),
                   jax.ShapeDtypeStruct((Nr, G), jnp.float32)),
        grid_spec=pltpu.PrefetchScalarGridSpec(
            num_scalar_prefetch=0,
            grid=(Nr // RT,),
            in_specs=[
                pl.BlockSpec((RT, D), lambda i: (i, 0)),
                pl.BlockSpec((D, 2 * G), lambda i: (0, 0)),
                pl.BlockSpec((1, 2 * G), lambda i: (0, 0)),
            ],
            out_specs=(
                pl.BlockSpec((RT, G), lambda i: (i, 0)),
                pl.BlockSpec((RT, G), lambda i: (i, 0)),
            ),
        ),
        compiler_params=pltpu.CompilerParams(
            dimension_semantics=("parallel",)),
    )(x_p, w_cat, b_cat)
    return pf[:Np], pb[:Np]


# ----------------------------------------------------------------------------
# kernel 2: BiLSTM recurrence (forward + backward per grid step), masked update
# ----------------------------------------------------------------------------
def _bilstm_kernel(pf_ref, pb_ref, mf_ref, mb_ref, whf_ref, whb_ref,
                   hf_out_ref, hb_out_ref,
                   hf_s, cf_s, hb_s, cb_s, *, H):
    @pl.when(pl.program_id(0) == 0)
    def _():
        for s in (hf_s, cf_s, hb_s, cb_s):
            s[...] = jnp.zeros_like(s)

    def _cell(pre, m, whh_ref, h_s, c_s, out_ref):
        h = h_s[...]
        c = c_s[...]
        gates = pre + jnp.dot(h, whh_ref[...],
                              preferred_element_type=jnp.float32)   # (B, 4H)
        i = jax.nn.sigmoid(gates[:, 0 * H:1 * H])
        f = jax.nn.sigmoid(gates[:, 1 * H:2 * H])
        g = jnp.tanh(gates[:, 2 * H:3 * H])
        o = jax.nn.sigmoid(gates[:, 3 * H:4 * H])
        c_new = f * c + i * g
        h_new = o * jnp.tanh(c_new)
        h_upd = m * h_new + (1.0 - m) * h      # padded steps keep the old state
        c_upd = m * c_new + (1.0 - m) * c
        h_s[...] = h_upd
        c_s[...] = c_upd
        out_ref[...] = (m * h_upd).astype(out_ref.dtype)   # padded steps emit 0

    _cell(pf_ref[...], mf_ref[...], whf_ref, hf_s, cf_s, hf_out_ref)
    _cell(pb_ref[...], mb_ref[...], whb_ref, hb_s, cb_s, hb_out_ref)


def _bilstm(proj_f, proj_b, m_tb1, whh_f, whh_b, B, T, H):
    G = 4 * H
    kernel = functools.partial(_bilstm_kernel, H=H)
    hf, hb = pl.pallas_call(
        kernel,
        out_shape=(jax.ShapeDtypeStruct((T, B, H), jnp.float32),
                   jax.ShapeDtypeStruct((T, B, H), jnp.float32)),
        grid_spec=pltpu.PrefetchScalarGridSpec(
            num_scalar_prefetch=0,
            grid=(T,),
            in_specs=[
                pl.BlockSpec((pl.Squeezed(), B, G), lambda t: (t, 0, 0)),
                pl.BlockSpec((pl.Squeezed(), B, G), lambda t: (T - 1 - t, 0, 0)),
                pl.BlockSpec((pl.Squeezed(), B, 1), lambda t: (t, 0, 0)),
                pl.BlockSpec((pl.Squeezed(), B, 1), lambda t: (T - 1 - t, 0, 0)),
                pl.BlockSpec((H, G), lambda t: (0, 0)),
                pl.BlockSpec((H, G), lambda t: (0, 0)),
            ],
            out_specs=(
                pl.BlockSpec((pl.Squeezed(), B, H), lambda t: (t, 0, 0)),
                pl.BlockSpec((pl.Squeezed(), B, H), lambda t: (T - 1 - t, 0, 0)),
            ),
            scratch_shapes=[pltpu.VMEM((B, H), jnp.float32)] * 4,
        ),
        compiler_params=pltpu.CompilerParams(
            dimension_semantics=("arbitrary",)),   # sequential recurrence
    )(proj_f, proj_b, m_tb1, m_tb1, whh_f, whh_b)
    return hf, hb


# ----------------------------------------------------------------------------
# kernel 3: label attention + final concat, on flattened (B*T) rows
# ----------------------------------------------------------------------------
def _label_att_kernel(hf_ref, hb_ref, m_ref, e_ref, et_ref, o_ref, w_ref):
    h = jnp.concatenate([hf_ref[...], hb_ref[...]], axis=-1)        # (RT, 2H)
    att = jnp.dot(h, e_ref[...], preferred_element_type=jnp.float32)  # (RT, L)
    att = att - jnp.max(att, axis=-1, keepdims=True)
    p = jnp.exp(att)
    w = p / jnp.sum(p, axis=-1, keepdims=True)                      # softmax
    w = w * m_ref[...]                                              # masked_fill(mask==0, 0)
    la = jnp.dot(w, et_ref[...], preferred_element_type=jnp.float32)  # (RT, 2H)
    o_ref[...] = jnp.concatenate([h, la], axis=-1).astype(o_ref.dtype)
    w_ref[...] = w.astype(w_ref.dtype)


def _label_attention(hf_bt, hb_bt, mask_flat, E, Et):
    N, H = hf_bt.shape
    L = E.shape[1]
    RT = _pick_row_tile(N)
    Nr = pl.cdiv(N, RT) * RT
    hf_p = _pad_rows(hf_bt, Nr)
    hb_p = _pad_rows(hb_bt, Nr)
    m_p = _pad_rows(mask_flat, Nr)
    out, w = pl.pallas_call(
        _label_att_kernel,
        out_shape=(jax.ShapeDtypeStruct((Nr, 4 * H), jnp.float32),
                   jax.ShapeDtypeStruct((Nr, L), jnp.float32)),
        grid_spec=pltpu.PrefetchScalarGridSpec(
            num_scalar_prefetch=0,
            grid=(Nr // RT,),
            in_specs=[
                pl.BlockSpec((RT, H), lambda i: (i, 0)),
                pl.BlockSpec((RT, H), lambda i: (i, 0)),
                pl.BlockSpec((RT, 1), lambda i: (i, 0)),
                pl.BlockSpec((2 * H, L), lambda i: (0, 0)),
                pl.BlockSpec((L, 2 * H), lambda i: (0, 0)),
            ],
            out_specs=(
                pl.BlockSpec((RT, 4 * H), lambda i: (i, 0)),
                pl.BlockSpec((RT, L), lambda i: (i, 0)),
            ),
        ),
        compiler_params=pltpu.CompilerParams(
            dimension_semantics=("parallel",)),
    )(hf_p, hb_p, m_p, E, Et)
    return out[:N], w[:N]


# ----------------------------------------------------------------------------
# full forward (equivalent of LabelAttBiLSTM.forward)
# ----------------------------------------------------------------------------
def label_att_bilstm_forward(x, mask, params):
    """x: (B, T, D); mask: (B, T) or None (right-padded); params in PyTorch layout.
    Returns (cat([lstm_out, label_att], -1): (B, T, 4H), weight: (B, T, L))."""
    B, T, D = x.shape
    H = params["w_hh_f"].shape[1]          # w_hh: (4H, H)
    G = 4 * H
    E = params["label_emb"].astype(jnp.float32)      # (2H, L)
    L = E.shape[1]

    # mask=None <=> all timesteps valid (identical semantics).
    mask_f = (jnp.ones((B, T), jnp.float32) if mask is None
              else mask.astype(jnp.float32))

    # Time-major activations for the recurrence (feature dim on the lane axis).
    x_tbd = jnp.transpose(x.astype(jnp.float32), (1, 0, 2))   # (T, B, D)
    m_tb1 = jnp.transpose(mask_f, (1, 0))[:, :, None]         # (T, B, 1)

    # 1) fused input projections for both directions (one big lane-dense matmul).
    w_cat = jnp.concatenate([params["w_ih_f"].T, params["w_ih_b"].T],
                            axis=1).astype(jnp.float32)       # (D, 8H)
    b_cat = jnp.concatenate([params["b_ih_f"] + params["b_hh_f"],
                             params["b_ih_b"] + params["b_hh_b"]]
                            )[None, :].astype(jnp.float32)    # (1, 8H)
    pf_flat, pb_flat = _input_projection(x_tbd.reshape(T * B, D), w_cat, b_cat, G)
    proj_f = pf_flat.reshape(T, B, G)
    proj_b = pb_flat.reshape(T, B, G)

    # 2) BiLSTM recurrence (sequential in T; masked == PackingRNN semantics).
    whh_f = params["w_hh_f"].T.astype(jnp.float32)            # (H, 4H)
    whh_b = params["w_hh_b"].T.astype(jnp.float32)
    hf_tbh, hb_tbh = _bilstm(proj_f, proj_b, m_tb1, whh_f, whh_b, B, T, H)

    # 3) label attention + concat on flattened B*T rows (layout plumbing only).
    hf_bt = jnp.transpose(hf_tbh, (1, 0, 2)).reshape(B * T, H)
    hb_bt = jnp.transpose(hb_tbh, (1, 0, 2)).reshape(B * T, H)
    m_flat = mask_f.reshape(B * T, 1)
    out_flat, w_flat = _label_attention(hf_bt, hb_bt, m_flat, E, E.T)

    return out_flat.reshape(B, T, 4 * H), w_flat.reshape(B, T, L)


# ----------------------------------------------------------------------------
# pure-JAX reference mirroring the PyTorch forward
# ----------------------------------------------------------------------------
def label_att_bilstm_reference(x, mask, params):
    B, T, D = x.shape
    H = params["w_hh_f"].shape[1]
    mask_f = (jnp.ones((B, T), jnp.float32) if mask is None
              else mask.astype(jnp.float32))

    def run_dir(wih, whh, bih, bhh, reverse):
        Wih, Whh, b = wih.T, whh.T, (bih + bhh)[None, :]

        def step(carry, inp):
            h, c = carry
            xt, mt = inp
            gates = xt @ Wih + h @ Whh + b
            i = jax.nn.sigmoid(gates[:, :H])
            f = jax.nn.sigmoid(gates[:, H:2 * H])
            g = jnp.tanh(gates[:, 2 * H:3 * H])
            o = jax.nn.sigmoid(gates[:, 3 * H:])
            c_new = f * c + i * g
            h_new = o * jnp.tanh(c_new)
            h2 = mt * h_new + (1 - mt) * h
            c2 = mt * c_new + (1 - mt) * c
            return (h2, c2), mt * h2

        xs = jnp.transpose(x.astype(jnp.float32), (1, 0, 2))
        ms = mask_f.T[:, :, None]
        if reverse:
            xs, ms = xs[::-1], ms[::-1]
        init = (jnp.zeros((B, H), jnp.float32), jnp.zeros((B, H), jnp.float32))
        _, hs = lax.scan(step, init, (xs, ms))
        if reverse:
            hs = hs[::-1]
        return jnp.transpose(hs, (1, 0, 2))

    hf = run_dir(params["w_ih_f"], params["w_hh_f"],
                 params["b_ih_f"], params["b_hh_f"], False)
    hb = run_dir(params["w_ih_b"], params["w_hh_b"],
                 params["b_ih_b"], params["b_hh_b"], True)
    lstm_out = jnp.concatenate([hf, hb], axis=-1)
    E = params["label_emb"].astype(jnp.float32)
    att = lstm_out @ E
    w = jax.nn.softmax(att, axis=-1)
    if mask is not None:
        w = w * mask_f[:, :, None]
    label_att = w @ E.T
    return jnp.concatenate([lstm_out, label_att], axis=-1), w


# ----------------------------------------------------------------------------
if __name__ == "__main__":
    # Small shapes consistent with the module: inputs (batch, seq, input_dim).
    B, T, D, H, L = 2, 8, 16, 32, 16

    key = jax.random.PRNGKey(0)
    ks = jax.random.split(key, 10)

    def rnd(k, shape, scale=0.1):
        return scale * jax.random.normal(k, shape, dtype=jnp.float32)

    params = dict(
        w_ih_f=rnd(ks[0], (4 * H, D)), w_hh_f=rnd(ks[1], (4 * H, H)),
        b_ih_f=rnd(ks[2], (4 * H,)), b_hh_f=rnd(ks[3], (4 * H,)),
        w_ih_b=rnd(ks[4], (4 * H, D)), w_hh_b=rnd(ks[5], (4 * H, H)),
        b_ih_b=rnd(ks[6], (4 * H,)), b_hh_b=rnd(ks[7], (4 * H,)),
        label_emb=rnd(ks[8], (2 * H, L), 0.5),
    )
    x = jax.random.normal(ks[9], (B, T, D), dtype=jnp.float32)

    # Right-padded mask (longest sequence uses the full T, as pad_packed assumes).
    lengths = jnp.array([T, 5])
    mask = (jnp.arange(T)[None, :] < lengths[:, None]).astype(jnp.float32)

    out, weight = label_att_bilstm_forward(x, mask, params)
    out = jax.block_until_ready(out)
    ref_out, ref_w = label_att_bilstm_reference(x, mask, params)

    assert out.shape == (B, T, 4 * H) and weight.shape == (B, T, L)
    assert jnp.allclose(out, ref_out, atol=1e-4, rtol=1e-4), "output mismatch"
    assert jnp.allclose(weight, ref_w, atol=1e-4, rtol=1e-4), "weight mismatch"

    # mask=None path (no packing, no weight masking).
    out2, weight2 = label_att_bilstm_forward(x, None, params)
    out2 = jax.block_until_ready(out2)
    ref_out2, ref_w2 = label_att_bilstm_reference(x, None, params)
    assert jnp.allclose(out2, ref_out2, atol=1e-4, rtol=1e-4)
    assert jnp.allclose(weight2, ref_w2, atol=1e-4, rtol=1e-4)

    print("KERNEL_OK")
</pallas_src>

<mosaic_0001>
module attributes {stable_mosaic.version = 11 : i64} {
  func.func @_input_proj_kernel(%arg0: i32, %arg1: memref<16x16xf32, #tpu.memory_space<vmem>>, %arg2: memref<16x256xf32, #tpu.memory_space<vmem>>, %arg3: memref<1x256xf32, #tpu.memory_space<vmem>>, %arg4: memref<16x128xf32, #tpu.memory_space<vmem>>, %arg5: memref<16x128xf32, #tpu.memory_space<vmem>>) attributes {dimension_semantics = [#tpu.dimension_semantics<parallel>], iteration_bounds = array<i64: 1>, scalar_prefetch = 0 : i64, scratch_operands = 0 : i64, tpu.core_type = #tpu.core_type<tc>, window_params = [{transform_indices = @transform_0, window_bounds = array<i64: 16, 16>}, {pipeline_mode = #tpu.pipeline_mode<synchronous>, transform_indices = @transform_1, window_bounds = array<i64: 16, 256>}, {pipeline_mode = #tpu.pipeline_mode<synchronous>, transform_indices = @transform_2, window_bounds = array<i64: 1, 256>}, {transform_indices = @transform_3, window_bounds = array<i64: 16, 128>}, {transform_indices = @transform_4, window_bounds = array<i64: 16, 128>}]} {
    %c0 = arith.constant 0 : index
    %c0_0 = arith.constant 0 : index
    %0 = vector.load %arg1[%c0, %c0_0] : memref<16x16xf32, #tpu.memory_space<vmem>>, vector<16x16xf32>
    %c0_1 = arith.constant 0 : index
    %c0_2 = arith.constant 0 : index
    %1 = vector.load %arg2[%c0_1, %c0_2] : memref<16x256xf32, #tpu.memory_space<vmem>>, vector<16x256xf32>
    %cst = arith.constant dense<0.000000e+00> : vector<16x256xf32>
    %2 = tpu.matmul %0, %1, %cst {dimension_numbers = #tpu.dot_dimension_numbers<[1], [0], [0], [1], [0, 0, 1, 1], [], []>, precision = #tpu.contract_precision<fp32>} : vector<16x16xf32>, vector<16x256xf32>, vector<16x256xf32> -> vector<16x256xf32>
    %c0_3 = arith.constant 0 : index
    %c0_4 = arith.constant 0 : index
    %3 = vector.load %arg3[%c0_3, %c0_4] : memref<1x256xf32, #tpu.memory_space<vmem>>, vector<1x256xf32>
    %4 = vector.broadcast %3 : vector<1x256xf32> to vector<16x256xf32>
    %5 = arith.addf %2, %4 : vector<16x256xf32>
    %6 = vector.extract_strided_slice %5 {offsets = [0, 0], sizes = [16, 128], strides = [1, 1]} : vector<16x256xf32> to vector<16x128xf32>
    %c0_5 = arith.constant 0 : index
    %c0_6 = arith.constant 0 : index
    %7 = vector.load %arg4[%c0_5, %c0_6] : memref<16x128xf32, #tpu.memory_space<vmem>>, vector<16x128xf32>
    tpu.vector_store %arg4[%c0_5, %c0_6], %6 {strides = array<i32>} : memref<16x128xf32, #tpu.memory_space<vmem>>, vector<16x128xf32>,
    %8 = vector.extract_strided_slice %5 {offsets = [0, 128], sizes = [16, 128], strides = [1, 1]} : vector<16x256xf32> to vector<16x128xf32>
    %c0_7 = arith.constant 0 : index
    %c0_8 = arith.constant 0 : index
    %9 = vector.load %arg5[%c0_7, %c0_8] : memref<16x128xf32, #tpu.memory_space<vmem>>, vector<16x128xf32>
    tpu.vector_store %arg5[%c0_7, %c0_8], %8 {strides = array<i32>} : memref<16x128xf32, #tpu.memory_space<vmem>>, vector<16x128xf32>,
    return
  }
  func.func @transform_0(%arg0: i32) -> (i32, i32) {
    %c0_i32 = arith.constant 0 : i32
    %c0_i32_0 = arith.constant 0 : i32
    return %arg0, %c0_i32 : i32, i32
  }
  func.func @transform_1(%arg0: i32) -> (i32, i32) {
    %c0_i32 = arith.constant 0 : i32
    %c0_i32_0 = arith.constant 0 : i32
    %c0_i32_1 = arith.constant 0 : i32
    return %c0_i32, %c0_i32_0 : i32, i32
  }
  func.func @transform_2(%arg0: i32) -> (i32, i32) {
    %c0_i32 = arith.constant 0 : i32
    %c0_i32_0 = arith.constant 0 : i32
    %c0_i32_1 = arith.constant 0 : i32
    return %c0_i32, %c0_i32_0 : i32, i32
  }
  func.func @transform_3(%arg0: i32) -> (i32, i32) {
    %c0_i32 = arith.constant 0 : i32
    %c0_i32_0 = arith.constant 0 : i32
    return %arg0, %c0_i32 : i32, i32
  }
  func.func @transform_4(%arg0: i32) -> (i32, i32) {
    %c0_i32 = arith.constant 0 : i32
    %c0_i32_0 = arith.constant 0 : i32
    return %arg0, %c0_i32 : i32, i32
  }
}

</mosaic_0001>

<bundles_post_ra>
// kernel: tpu_custom_call.1
= control target key start
LH: loop header
LB: loop body
LE: loop exit
PB: predicated region body
PF: predicated region fallthrough
CT: control target
= control target key end

     0   :  { %10 = vsyncpa [#allocation3], 0  ;;  %s915_s0 = inlined_call_operand.hbm [shape: f32[16,16], index: 0, kind: input, shape index: {}]   ;;  %s916_s1 = inlined_call_operand.hbm [shape: f32[16,256], index: 1, kind: input, shape index: {}]   ;;  %s917_s2 = inlined_call_operand.vmem [shape: f32[1,256], index: 2, kind: input, shape index: {}]   ;;  %s918_s3 = inlined_call_operand.hbm [shape: f32[16,128], index: 3, kind: output, shape index: {0}]   ;;  %s919_s4 = inlined_call_operand.hbm [shape: f32[16,128], index: 4, kind: output, shape index: {1}]  }
   0x1   :  { %11 = vsyncpa [#allocation6], 0 }
   0x2   :  { %12 = vsyncpa [#allocation4], 0 }
   0x3   :  { %13 = vsyncpa [#allocation9], 0  ;;  %s802_s15 = smov [#allocation2]   ;;  %s706_s19 = scalar_lea.hbm %s915_s0, 256 }
   0x4   :  { %s19_s16 = sshll.u32 %s802_s15, 4  ;;  %p707_p0 = scmp.ne.s32.totalorder %s915_s0, %s706_s19  ;;  %s20_s16 = int_to_ptr.vmem [resolvable:$true] %s19_s16 }
   0x5   :  { %p710_p1 = scmp.lt.u32.totalorder %s706_s19, %s915_s0 }
   0x7   :  { %p712_p2 = pnand %p710_p1, %p707_p0 }
   0x9   :  { %715 = shalt.err (!%p712_p2)
}
   0xa   :  { %s716_s24 = scalar_lea.vmem %s20_s16, 256  ;;  %p721_p4 = scmp.lt.s32.totalorder %s20_s16, %s20_s16 }
   0xb   :  { %p717_p3 = scmp.ne.s32.totalorder %s20_s16, %s716_s24  ;;  %p722_p5 = scmp.lt.s32.totalorder %s716_s24, %s716_s24 }
   0xd   :  { %p723_p6 = por %p722_p5, %p721_p4 }
   0xf   :  { %p724_p7 = pnand %p723_p6, %p717_p3 }
  0x11   :  { %727 = shalt.err (!%p724_p7)
}
  0x12   :  { %s803_s25 = smov 128   ;;  %s804_s26 = smov 8  }
  0x13   :  { %25 = dma.hbm_to_vmem [thread:$0]  %s915_s0, 256, %s20_s16, [#allocation3], %s803_s25, %s803_s25, %s804_s26  }
  0x14   :  { %s805_s29 = smov [#allocation5]   ;;  %s728_s7 = scalar_lea.hbm %s916_s1, 512 }
  0x15   :  { %s31_s30 = sshll.u32 %s805_s29, 4  ;;  %p729_p8 = scmp.ne.s32.totalorder %s916_s1, %s728_s7  ;;  %s32_s30 = int_to_ptr.vmem [resolvable:$true] %s31_s30 }
  0x16   :  { %p732_p9 = scmp.lt.u32.totalorder %s728_s7, %s916_s1 }
  0x18   :  { %p734_p10 = pnand %p732_p9, %p729_p8 }
  0x1a   :  { %737 = shalt.err (!%p734_p10)
}
  0x1b   :  { %s738_s12 = scalar_lea.vmem %s32_s30, 512  ;;  %p743_p12 = scmp.lt.s32.totalorder %s32_s30, %s32_s30 }
  0x1c   :  { %p739_p11 = scmp.ne.s32.totalorder %s32_s30, %s738_s12  ;;  %p744_p13 = scmp.lt.s32.totalorder %s738_s12, %s738_s12 }
  0x1e   :  { %p745_p0 = por %p744_p13, %p743_p12 }
  0x20   :  { %p746_p1 = pnand %p745_p0, %p739_p11 }
  0x22   :  { %749 = shalt.err (!%p746_p1)
}
  0x23   :  { %s806_s0 = smov 256   ;;  %s807_s13 = smov 16  }
  0x24   :  { %37 = dma.hbm_to_vmem [thread:$0]  %s916_s1, 512, %s32_s30, [#allocation6], %s806_s0, %s806_s0, %s807_s13  }
  0x25   :  { %794 = dma.done.wait [#allocation3], 256  }
  0x26   :  { %795 = vsyncadd [#allocation3], 4294967040 }
  0x27   :  { %796 = dma.done.wait [#allocation6], 512  }
  0x28   :  { %797 = vsyncadd [#allocation6], 4294966784  ;;  %v808_v0 = vmov 0.0   ;;  %vm64_vm0 = vcmask 130048   ;;  %v49_v1 = vld [vmem:[#allocation5 + $0x8] sm:$0xff]  ;;  %v51_v2 = vld [vmem:[#allocation5 + $0x18] sm:$0xff]  ;;  %v54_v47 = vlaneseq }
  0x29   :  { %418 = vmatprep.mubr.f32.mxu0 %v808_v0  ;;  %139 = vmatprep.mubr.f32.mxu1 %v808_v0  ;;  %v48_v3 = vld [vmem:[#allocation5] sm:$0xff]  ;;  %v71_v4 = vand.u32 4294901760, %v49_v1  ;;  %v75_v5 = vand.u32 4294901760, %v51_v2  ;;  %v50_v6 = vld [vmem:[#allocation5 + $0x10] sm:$0xff]  ;;  %v47_v9 = vld [vmem:[#allocation2 + $0x8] sm:$0xff]  ;;  %s809_s17 = smov [#allocation7]  }
  0x2a   :  { %v73_v7 = vand.u32 4294901760, %v48_v3  ;;  %v46_v8 = vld [vmem:[#allocation2] sm:$0xff]  ;;  %v77_v10 = vand.u32 4294901760, %v50_v6  ;;  %v69_v12 = vsel %vm64_vm0, %v47_v9, 0  ;;  %v55_v48 = vshrl.u32 %v54_v47, 7  ;;  %s620_s18 = sshll.u32 %s809_s17, 4  ;;  %s621_s18 = int_to_ptr.vmem [resolvable:$true] %s620_s18 }
  0x2b   :  { %v66_v11 = vsel %vm64_vm0, %v46_v8, 0  ;;  %v649_v13 = vpack.c.bf16 %v75_v5, %v71_v4  ;;  %v163_v14 = vsub.f32 %v49_v1, %v71_v4  ;;  %v175_v15 = vsub.f32 %v51_v2, %v75_v5  ;;  %v52_v50 = vld [vmem:[%s917_s2] sm:$0x3]  ;;  %s810_s2 = smov [#allocation8]   ;;  %s750_s20 = scalar_lea.vmem %s621_s18, 256 }
  0x2c   :  { %v169_v16 = vsub.f32 %v48_v3, %v73_v7  ;;  %v651_v17 = vpack.c.bf16 %v77_v10, %v73_v7  ;;  %v181_v18 = vsub.f32 %v50_v6, %v77_v10  ;;  %v140_v19 = vand.u32 4294901760, %v66_v11  ;;  %s632_s19 = sshll.u32 %s810_s2, 4  ;;  %p751_p2 = scmp.ne.s32.totalorder %s621_s18, %s750_s20  ;;  %s878_s19 = int_to_ptr.vmem [resolvable:$true] %s632_s19 }
  0x2d   :  { %v151_v20 = vand.u32 4294901760, %v69_v12  ;;  %662 = vmatprep.subr.bf16.mxu0 %v649_v13  ;;  %650 = vmatprep.subr.bf16.mxu1 %v649_v13  ;;  %v164_v21 = vand.u32 4294901760, %v163_v14  ;;  %v176_v22 = vand.u32 4294901760, %v175_v15  ;;  %v657_v44 = vpack.c.bf16 %v175_v15, %v163_v14  ;;  %p755_p3 = scmp.lt.s32.totalorder %s621_s18, %s621_s18  ;;  %p756_p4 = scmp.lt.s32.totalorder %s750_s20, %s750_s20 }
  0x2e   :  { %v170_v23 = vand.u32 4294901760, %v169_v16  ;;  %664 = vmatpush1.bf16.msra.mxu0 %v651_v17  ;;  %652 = vmatpush1.bf16.msra.mxu1 %v651_v17  ;;  %v141_v24 = vsub.f32 %v66_v11, %v140_v19  ;;  %v182_v26 = vand.u32 4294901760, %v181_v18  ;;  %v659_v46 = vpack.c.bf16 %v181_v18, %v169_v16 }
  0x2f   :  { %v152_v25 = vsub.f32 %v69_v12, %v151_v20  ;;  %v165_v27 = vsub.f32 %v163_v14, %v164_v21  ;;  %v177_v28 = vsub.f32 %v175_v15, %v176_v22  ;;  %v665_v29 = vpack.c.bf16 %v176_v22, %v164_v21  ;;  %p757_p5 = por %p756_p4, %p755_p3 }
  0x30   :  { %v171_v30 = vsub.f32 %v169_v16, %v170_v23  ;;  %v142_v31 = vand.u32 4294901760, %v141_v24  ;;  %v183_v33 = vsub.f32 %v181_v18, %v182_v26  ;;  %v667_v34 = vpack.c.bf16 %v182_v26, %v170_v23 }
  0x31   :  { %v153_v32 = vand.u32 4294901760, %v152_v25  ;;  %v166_v35 = vand.u32 4294901760, %v165_v27  ;;  %v178_v36 = vand.u32 4294901760, %v177_v28  ;;  %666 = vmatprep.subr.bf16.mxu0 %v665_v29  ;;  %v56_v49 = vsub.s32 0, %v55_v48  ;;  %p758_p6 = pnand %p757_p5, %p751_p2 }
  0x32   :  { %v172_v37 = vand.u32 4294901760, %v171_v30  ;;  %422 = vmatmul.mubr.f32.vlgmr.msra.gmra.mrb[0].mxu0 %v142_v31  ;;  %v143_v38 = vsub.f32 %v141_v24, %v142_v31  ;;  %v184_v39 = vand.u32 4294901760, %v183_v33  ;;  %v60_v51 = vsub.s32 1, %v55_v48 }
  0x33   :  { %v154_v40 = vsub.f32 %v152_v25, %v153_v32  ;;  %427 = vmatprep.mubr.f32.mxu0 %v808_v0  ;;  %v653_v41 = vpack.c.bf16 %v178_v36, %v166_v35  ;;  %668 = vmatpush1.bf16.msra.mxu0 %v667_v34  ;;  %v57_v54 = vrot.slane %v52_v50, %v56_v49 }
  0x34   :  { %v144_v42 = vand.u32 4294901760, %v143_v38  ;;  %v655_v43 = vpack.c.bf16 %v184_v39, %v172_v37  ;;  %670 = vmatprep.subr.bf16.mxu0 %v649_v13  ;;  %v61_v55 = vrot.slane %v52_v50, %v60_v51 }
  0x35   :  { %654 = vmatprep.subr.bf16.mxu1 %v653_v41  ;;  %v155_v45 = vand.u32 4294901760, %v154_v40 }
  0x36   :  { %145 = vmatmul.mubr.f32.vlgmr.msra.gmra.mrb[0].mxu1 %v144_v42  ;;  %431 = vmatmul.mubr.f32.gmra.mrb[2].mxu0 %v153_v32 }
  0x37   :  { %656 = vmatpush1.bf16.msra.mxu1 %v655_v43  ;;  %150 = vmatprep.mubr.f32.mxu1 %v808_v0 }
  0x38   :  { %513 = vmatprep.mubr.f32.mxu0 %v808_v0  ;;  %658 = vmatprep.subr.bf16.mxu1 %v657_v44 }
  0x3a   :  { %156 = vmatmul.mubr.f32.gmra.mrb[2].mxu1 %v155_v45  ;;  %515 = vmatmul.mubr.f32.vlgmr.msra.gmra.mrb[0].mxu0 %v140_v19 }
  0x3b   :  { %246 = vmatprep.mubr.f32.mxu1 %v808_v0  ;;  %520 = vmatprep.mubr.f32.mxu0 %v808_v0 }
  0x3c   :  { %672 = vmatpush1.bf16.msra.mxu0 %v651_v17 }
  0x3e   :  { %248 = vmatmul.mubr.f32.vlgmr.msra.gmra.mrb[0].mxu1 %v140_v19  ;;  %522 = vmatmul.mubr.f32.gmra.mrb[2].mxu0 %v151_v20 }
  0x3f   :  { %660 = vmatpush1.bf16.msra.mxu1 %v659_v46  ;;  %253 = vmatprep.mubr.f32.mxu1 %v808_v0 }
  0x40   :  { %596 = vmatprep.mubr.f32.mxu0 %v808_v0 }
  0x42   :  { %255 = vmatmul.mubr.f32.gmra.mrb[2].mxu1 %v151_v20  ;;  %598 = vmatmul.mubr.f32.vlgmr.msra.gmra.mrb[0].mxu0 %v140_v19 }
  0x43   :  { %333 = vmatprep.mubr.f32.mxu1 %v808_v0  ;;  %603 = vmatprep.mubr.f32.mxu0 %v808_v0 }
  0x46   :  { %336 = vmatmul.mubr.f32.vlgmr.msra.gmra.mrb[0].mxu1 %v141_v24  ;;  %605 = vmatmul.mubr.f32.gmra.mrb[2].mxu0 %v151_v20 }
  0x47   :  { %341 = vmatprep.mubr.f32.mxu1 %v808_v0 }
  0x4a   :  { %344 = vmatmul.mubr.f32.gmra.mrb[2].mxu1 %v152_v25 }
 0x115   :  { %v599_v52 = vpop.f32.mrb[0].mxu0 }
 0x116   :  { %v601_v53 = vpop.f32.mrb[1].mxu0 }
 0x119   :  { %v337_v56 = vpop.f32.mrb[0].mxu1  ;;  %v606_v57 = vpop.f32.mrb[2].mxu0 }
 0x11a   :  { %v673_v58 = vadd.f32 %v337_v56, %v57_v54  ;;  %v339_v59 = vpop.f32.mrb[1].mxu1  ;;  %v608_v60 = vpop.f32.mrb[3].mxu0 }
 0x11b   :  { %v675_v61 = vadd.f32 %v339_v59, %v61_v55 }
 0x11c   :  { %v674_v62 = vadd.f32 %v673_v58, %v599_v52 }
 0x11d   :  { %v676_v63 = vadd.f32 %v675_v61, %v601_v53  ;;  %v345_v0 = vpop.f32.mrb[2].mxu1 }
 0x11e   :  { %611 = vst [vmem:[#allocation7] sm:$0xff] %v674_v62  ;;  %v677_v1 = vadd.f32 %v345_v0, %v57_v54  ;;  %v347_v2 = vpop.f32.mrb[3].mxu1 }
 0x11f   :  { %613 = vst [vmem:[#allocation8] sm:$0xff] %v676_v63  ;;  %v679_v3 = vadd.f32 %v347_v2, %v61_v55 }
 0x120   :  { %v678_v4 = vadd.f32 %v677_v1, %v606_v57 }
 0x121   :  { %v680_v5 = vadd.f32 %v679_v3, %v608_v60 }
 0x122   :  { %612 = vst [vmem:[#allocation7 + $0x8] sm:$0xff] %v678_v4 }
 0x123   :  { %614 = vst [vmem:[#allocation8 + $0x8] sm:$0xff] %v680_v5 }
 0x124   :  { %761 = shalt.err (!%p758_p6)
}
 0x125   :  { %s762_s23 = scalar_lea.hbm %s918_s3, 256 }
 0x126   :  { %p763_p7 = scmp.ne.s32.totalorder %s918_s3, %s762_s23  ;;  %p766_p8 = scmp.lt.u32.totalorder %s762_s23, %s918_s3 }
 0x128   :  { %p768_p9 = pnand %p766_p8, %p763_p7 }
 0x12a   :  { %771 = shalt.err (!%p768_p9)
}
 0x12b   :  { %626 = dma.vmem_to_hbm [thread:$0]  %s621_s18, 256, %s918_s3, [#allocation4], %s803_s25, %s803_s25, %s804_s26  }
 0x12c   :  { %s772_s6 = scalar_lea.vmem %s878_s19, 256  ;;  %p777_p11 = scmp.lt.s32.totalorder %s878_s19, %s878_s19 }
 0x12d   :  { %p773_p10 = scmp.ne.s32.totalorder %s878_s19, %s772_s6  ;;  %p778_p12 = scmp.lt.s32.totalorder %s772_s6, %s772_s6 }
 0x12f   :  { %p779_p13 = por %p778_p12, %p777_p11 }
 0x131   :  { %p780_p0 = pnand %p779_p13, %p773_p10 }
 0x133   :  { %783 = shalt.err (!%p780_p0)
}
 0x134   :  { %s784_s9 = scalar_lea.hbm %s919_s4, 256 }
 0x135   :  { %p785_p1 = scmp.ne.s32.totalorder %s919_s4, %s784_s9  ;;  %p788_p2 = scmp.lt.u32.totalorder %s784_s9, %s919_s4 }
 0x137   :  { %p790_p3 = pnand %p788_p2, %p785_p1 }
 0x139   :  { %793 = shalt.err (!%p790_p3)
}
 0x13a   :  { %638 = dma.vmem_to_hbm [thread:$0]  %s878_s19, 256, %s919_s4, [#allocation9], %s803_s25, %s803_s25, %s804_s26  }
 0x13b   :  { %798 = dma.done.wait [#allocation4], 256  }
 0x13c   :  { %799 = vsyncadd [#allocation4], 4294967040 }
 0x13d   :  { %800 = dma.done.wait [#allocation9], 256  }
 0x13e   :  { %801 = vsyncadd [#allocation9], 4294967040 }
 0x13f   :  { %645 = vsyncpa [#allocation3], 1 }
 0x140   :  { %646 = vsyncpa [#allocation6], 1 }
 0x141   :  { %647 = vsyncpa [#allocation4], 1 }
 0x142   :  { %648 = vsyncpa [#allocation9], 1 }

</bundles_post_ra>
